<compile_context>
chip_gen: v6e
topology: v6e:2x2x1
jax: 0.10.0
libtpu: 0.0.40
codegen_flags: <defaults>
</compile_context>

<pallas_src>
import functools

import jax
import jax.numpy as jnp
from jax.experimental import pallas as pl
from jax.experimental.pallas import tpu as pltpu


# bf16 MXU operands (f32 accumulation).  Set to jnp.float32 for bit-closer numerics.
MATMUL_DTYPE = jnp.bfloat16

_VMEM_LIMIT = 64 * 1024 * 1024  # fits v7x's 64 MiB/TC; > default scoped limits


# ------------------------------ tiling helpers ------------------------------ #

def _pick_tile(dim, target, align):
    """Largest tile <= target that divides dim and respects alignment.

    Falls back to the whole axis only when it is not a VMEM blow-up (<= 2*target);
    otherwise raises instead of silently creating a huge block.
    """
    if dim <= target:
        return dim
    t = (target // align) * align
    while t >= align:
        if dim % t == 0:
            return t
        t -= align
    if dim <= 2 * target:
        return dim
    raise ValueError(f"no suitable tile for dim={dim} target={target} align={align}")


# ----------------------------- Pallas kernels ------------------------------ #

def _gelu_tanh(x):
    # TODO(synk): PyTorch nn.GELU() default is the exact erf form; the tanh
    # approximation is used here (EUP-friendly on TPU), ~1e-3 level difference.
    c = 0.7978845608028654  # sqrt(2/pi)
    return 0.5 * x * (1.0 + jnp.tanh(c * (x + 0.044715 * x * x * x)))


def _matmul2d_kernel(*refs, has_ln, has_bias, has_res, activation):
    """Single-K-step matmul: o = act([LN](x) @ w + bias) + residual.

    Grid is (M//tm, N//tn).  When LN is fused, the normalized rows are computed
    once per row-block (at j == 0) into a VMEM scratch in MATMUL_DTYPE and reused
    for every output tile j.  No accumulator scratch is needed (K is whole).
    """
    idx = 0
    x_ref = refs[idx]; idx += 1
    w_ref = refs[idx]; idx += 1
    if has_ln:
        g_ref = refs[idx]; lb_ref = refs[idx + 1]; idx += 2
    if has_bias:
        bias_ref = refs[idx]; idx += 1
    if has_res:
        res_ref = refs[idx]; idx += 1
    o_ref = refs[idx]; idx += 1

    if has_ln:
        xn_ref = refs[idx]

        @pl.when(pl.program_id(1) == 0)
        def _compute_ln():
            x = x_ref[...].astype(jnp.float32)
            mean = jnp.mean(x, axis=-1, keepdims=True)
            var = jnp.mean((x - mean) ** 2, axis=-1, keepdims=True)
            xn = (x - mean) * jax.lax.rsqrt(var + 1e-5)
            xn = xn * g_ref[...].astype(jnp.float32) + lb_ref[...].astype(jnp.float32)
            xn_ref[...] = xn.astype(xn_ref.dtype)

        lhs = xn_ref[...]
    else:
        lhs = x_ref[...].astype(MATMUL_DTYPE)

    y = jnp.dot(lhs, w_ref[...].astype(MATMUL_DTYPE),
                preferred_element_type=jnp.float32)
    if has_bias:
        y = y + bias_ref[...].astype(jnp.float32)
    if activation == "gelu":
        y = _gelu_tanh(y)
    if has_res:
        y = y + res_ref[...].astype(jnp.float32)
    o_ref[...] = y.astype(o_ref.dtype)


def _matmul3d_kernel(*refs, has_bias, has_res, activation):
    """K-tiled matmul with f32 VMEM accumulator (no LN fusion on this path)."""
    idx = 0
    x_ref = refs[idx]; idx += 1
    w_ref = refs[idx]; idx += 1
    if has_bias:
        bias_ref = refs[idx]; idx += 1
    if has_res:
        res_ref = refs[idx]; idx += 1
    o_ref = refs[idx]; idx += 1
    acc_ref = refs[idx]

    k = pl.program_id(2)
    nk = pl.num_programs(2)

    @pl.when(k == 0)
    def _init():
        acc_ref[...] = jnp.zeros_like(acc_ref)

    acc_ref[...] += jnp.dot(x_ref[...].astype(MATMUL_DTYPE),
                            w_ref[...].astype(MATMUL_DTYPE),
                            preferred_element_type=jnp.float32)

    @pl.when(k == nk - 1)
    def _finalize():
        y = acc_ref[...]
        if has_bias:
            y = y + bias_ref[...].astype(jnp.float32)
        if activation == "gelu":
            y = _gelu_tanh(y)
        if has_res:
            y = y + res_ref[...].astype(jnp.float32)
        o_ref[...] = y.astype(o_ref.dtype)


def fused_linear(x2d, w, *, ln=None, bias=None, residual=None, activation="none",
                 tm=512, tn=512, tk=512):
    """y = act([LN](x) @ w + bias) + residual, tiled over (M, N[, K])."""
    M, K = x2d.shape
    K2, N = w.shape
    assert K == K2
    has_ln = ln is not None
    has_bias = bias is not None
    has_res = residual is not None

    tm = _pick_tile(M, tm, 8)
    tn = _pick_tile(N, tn, 128)
    tk_eff = K if has_ln else _pick_tile(K, tk, 128)  # LN needs whole rows
    nk = K // tk_eff

    n_trans = (M * N if activation == "gelu" else 0) + (M if has_ln else 0)
    cost = pl.CostEstimate(
        flops=2 * M * N * K,
        transcendentals=n_trans,
        bytes_accessed=4 * (M * K + K * N + M * N
                            + (M * N if has_res else 0) + (N if has_bias else 0)))

    if nk == 1:
        in_specs = [pl.BlockSpec((tm, K), lambda i, j: (i, 0)),
                    pl.BlockSpec((K, tn), lambda i, j: (0, j))]
        args = [x2d, w]
        if has_ln:
            g, b = ln
            in_specs += [pl.BlockSpec((1, K), lambda i, j: (0, 0)),
                         pl.BlockSpec((1, K), lambda i, j: (0, 0))]
            args += [g, b]
        if has_bias:
            in_specs.append(pl.BlockSpec((1, tn), lambda i, j: (0, j)))
            args.append(bias)
        if has_res:
            in_specs.append(pl.BlockSpec((tm, tn), lambda i, j: (i, j)))
            args.append(residual)
        scratch = [pltpu.VMEM((tm, K), MATMUL_DTYPE)] if has_ln else []
        kernel = functools.partial(_matmul2d_kernel, has_ln=has_ln,
                                   has_bias=has_bias, has_res=has_res,
                                   activation=activation)
        return pl.pallas_call(
            kernel,
            grid=(M // tm, N // tn),
            out_shape=jax.ShapeDtypeStruct((M, N), x2d.dtype),
            in_specs=in_specs,
            out_specs=pl.BlockSpec((tm, tn), lambda i, j: (i, j)),
            scratch_shapes=scratch,
            compiler_params=pltpu.CompilerParams(
                dimension_semantics=("parallel", "arbitrary"),
                vmem_limit_bytes=_VMEM_LIMIT),
            cost_estimate=cost,
        )(*args)

    # K-tiled path (LN is never fused here).
    assert not has_ln
    in_specs = [pl.BlockSpec((tm, tk_eff), lambda i, j, k: (i, k)),
                pl.BlockSpec((tk_eff, tn), lambda i, j, k: (k, j))]
    args = [x2d, w]
    if has_bias:
        in_specs.append(pl.BlockSpec((1, tn), lambda i, j, k: (0, j)))
        args.append(bias)
    if has_res:
        in_specs.append(pl.BlockSpec((tm, tn), lambda i, j, k: (i, j)))
        args.append(residual)
    kernel = functools.partial(_matmul3d_kernel, has_bias=has_bias,
                               has_res=has_res, activation=activation)
    return pl.pallas_call(
        kernel,
        grid=(M // tm, N // tn, nk),
        out_shape=jax.ShapeDtypeStruct((M, N), x2d.dtype),
        in_specs=in_specs,
        out_specs=pl.BlockSpec((tm, tn), lambda i, j, k: (i, j)),
        scratch_shapes=[pltpu.VMEM((tm, tn), jnp.float32)],
        compiler_params=pltpu.CompilerParams(
            dimension_semantics=("parallel", "parallel", "arbitrary"),
            vmem_limit_bytes=_VMEM_LIMIT),
        cost_estimate=cost,
    )(*args)


def _ln_kernel(x_ref, g_ref, b_ref, o_ref):
    x = x_ref[...].astype(jnp.float32)
    mean = jnp.mean(x, axis=-1, keepdims=True)
    var = jnp.mean((x - mean) ** 2, axis=-1, keepdims=True)
    y = (x - mean) * jax.lax.rsqrt(var + 1e-5)
    o_ref[...] = (y * g_ref[...] + b_ref[...]).astype(o_ref.dtype)


def layernorm(x2d, gamma, beta, tm=512):
    """Standalone LayerNorm (only used for the final norm_out), row-tiled."""
    M, D = x2d.shape
    tm = _pick_tile(M, tm, 8)
    return pl.pallas_call(
        _ln_kernel,
        grid=(M // tm,),
        out_shape=jax.ShapeDtypeStruct((M, D), x2d.dtype),
        in_specs=[pl.BlockSpec((tm, D), lambda i: (i, 0)),
                  pl.BlockSpec((1, D), lambda i: (0, 0)),
                  pl.BlockSpec((1, D), lambda i: (0, 0))],
        out_specs=pl.BlockSpec((tm, D), lambda i: (i, 0)),
        compiler_params=pltpu.CompilerParams(
            dimension_semantics=("parallel",), vmem_limit_bytes=_VMEM_LIMIT),
    )(x2d, gamma, beta)


def _attn_kernel(*refs, num_heads, scale, fused_qkv):
    """One batch element per program.

    Inputs stay in projection layout ([q|k|v] or q + [k|v] along the last dim),
    heads are split with static lane slices inside the kernel, and the output is
    written as (Nq, D) with heads merged (lane-dense HBM block).
    """
    if fused_qkv:
        qkv_ref, bias_ref, o_ref = refs
        q_src, kv_src = qkv_ref, qkv_ref
    else:
        q_ref, kv_ref, bias_ref, o_ref = refs
        q_src, kv_src = q_ref, kv_ref

    nq, d = o_ref.shape
    dh = d // num_heads
    k_base = d if fused_qkv else 0
    v_base = k_base + d

    for h in range(num_heads):
        lo = h * dh
        # Fold the softmax scale into q (f32), then cast operands for the MXU.
        q_h = (q_src[:, lo:lo + dh].astype(jnp.float32) * scale).astype(MATMUL_DTYPE)
        k_h = kv_src[:, k_base + lo:k_base + lo + dh].astype(MATMUL_DTYPE)
        v_h = kv_src[:, v_base + lo:v_base + lo + dh].astype(MATMUL_DTYPE)

        # scores: contraction over dh of both operands (q @ k^T, no transpose op).
        s = jax.lax.dot_general(q_h, k_h, (((1,), (1,)), ((), ())),
                                preferred_element_type=jnp.float32)
        s = s + bias_ref[h].astype(jnp.float32)
        s = s - jnp.max(s, axis=-1, keepdims=True)
        p = jnp.exp(s)
        p = p * pl.reciprocal(jnp.sum(p, axis=-1, keepdims=True), approx=True)

        o_h = jnp.dot(p.astype(MATMUL_DTYPE), v_h,
                      preferred_element_type=jnp.float32)
        o_ref[:, lo:lo + dh] = o_h.astype(o_ref.dtype)
    # TODO(synk): for long sequences, add a (head-chunk, q-tile) grid axis and a
    # flash-style online softmax so the (Nq, Nk) score tiles stay small on v7x's
    # 64 MiB VMEM; rel_bias could then be single-buffered (pipeline_mode).


def attention_core(q_src, kv_src, rel_bias, num_heads, scale):
    """softmax(q k^T * scale + bias) v, heads merged in the output.

    q_src: (B, Nq, 3D) holding [q|k|v] when kv_src is None (self-attention),
           otherwise (B, Nq, D).
    kv_src: (B, Nk, 2D) holding [k|v], or None.
    rel_bias: (H, Nq, Nk), shared over batch.  Returns (B, Nq, D).
    """
    B, Nq = q_src.shape[0], q_src.shape[1]
    if kv_src is None:
        D = q_src.shape[-1] // 3
        Nk = Nq
        in_specs = [pl.BlockSpec((None, Nq, 3 * D), lambda b: (b, 0, 0)),
                    pl.BlockSpec((num_heads, Nq, Nk), lambda b: (0, 0, 0))]
        args = (q_src, rel_bias)
        fused = True
        in_bytes = q_src.size
    else:
        D = q_src.shape[-1]
        Nk = kv_src.shape[1]
        in_specs = [pl.BlockSpec((None, Nq, D), lambda b: (b, 0, 0)),
                    pl.BlockSpec((None, Nk, 2 * D), lambda b: (b, 0, 0)),
                    pl.BlockSpec((num_heads, Nq, Nk), lambda b: (0, 0, 0))]
        args = (q_src, kv_src, rel_bias)
        fused = False
        in_bytes = q_src.size + kv_src.size
    assert rel_bias.shape == (num_heads, Nq, Nk), (
        "relative_position_bias must be (H, Nq, Nk); shared bias requires Nk == Nq "
        "for cross-attention, as in the PyTorch reference.")

    dh = D // num_heads
    cost = pl.CostEstimate(
        flops=4 * B * num_heads * Nq * Nk * dh,
        transcendentals=B * num_heads * Nq * Nk,
        bytes_accessed=4 * (in_bytes + rel_bias.size + B * Nq * D))

    return pl.pallas_call(
        functools.partial(_attn_kernel, num_heads=num_heads, scale=scale,
                          fused_qkv=fused),
        grid=(B,),
        out_shape=jax.ShapeDtypeStruct((B, Nq, D), q_src.dtype),
        in_specs=in_specs,
        out_specs=pl.BlockSpec((None, Nq, D), lambda b: (b, 0, 0)),
        compiler_params=pltpu.CompilerParams(
            dimension_semantics=("parallel",), vmem_limit_bytes=_VMEM_LIMIT),
        cost_estimate=cost,
    )(*args)


# ------------------------------- glue (JAX) -------------------------------- #

def self_attention_block(x, rel_bias, p, num_heads):
    B, N, D = x.shape
    scale = (D // num_heads) ** (-0.5)
    x2d = x.reshape(B * N, D)
    # LN fused into the QKV projection (to_qkv has no bias).
    qkv = fused_linear(x2d, p["w_qkv"], ln=(p["ln_g"], p["ln_b"]))      # (B*N, 3D)
    out = attention_core(qkv.reshape(B, N, 3 * D), None, rel_bias,
                         num_heads, scale)                              # (B, N, D)
    # out projection with bias + residual fused.
    y = fused_linear(out.reshape(B * N, D), p["w_out"], bias=p["b_out"],
                     residual=x2d)
    return y.reshape(B, N, D)


def cross_attention_block(x, context, rel_bias, p, num_heads):
    B, N, D = x.shape
    M = context.shape[1]
    scale = (D // num_heads) ** (-0.5)
    x2d = x.reshape(B * N, D)
    c2d = context.reshape(B * M, D)
    # NOTE: the same input_norm params apply to x and context (as in PyTorch).
    q = fused_linear(x2d, p["w_q"], ln=(p["ln_g"], p["ln_b"]))          # (B*N, D)
    kv = fused_linear(c2d, p["w_kv"], ln=(p["ln_g"], p["ln_b"]))        # (B*M, 2D)
    out = attention_core(q.reshape(B, N, D), kv.reshape(B, M, 2 * D),
                         rel_bias, num_heads, scale)                    # (B, N, D)
    y = fused_linear(out.reshape(B * N, D), p["w_out"], bias=p["b_out"],
                     residual=x2d)
    return y.reshape(B, N, D)


def ffn_block(x, p):
    B, N, D = x.shape
    x2d = x.reshape(B * N, D)
    h = fused_linear(x2d, p["w1"], ln=(p["ln_g"], p["ln_b"]), bias=p["b1"],
                     activation="gelu")
    y = fused_linear(h, p["w2"], bias=p["b2"], residual=x2d)
    return y.reshape(B, N, D)


def base_transformer_cross_attn(x, context, rel_bias, params, num_heads,
                                output_layers=None):
    outputs = []
    for i, lp in enumerate(params["layers"]):
        x = self_attention_block(x, rel_bias, lp["self_attn"], num_heads)
        x = cross_attention_block(x, context, rel_bias, lp["cross_attn"], num_heads)
        x = ffn_block(x, lp["ffn"])
        if output_layers is not None and i in output_layers:
            outputs.append(x)
    B, N, D = x.shape
    if output_layers is None:
        return layernorm(x.reshape(B * N, D), params["norm_g"],
                         params["norm_b"]).reshape(B, N, D)
    last = outputs[-1]
    outputs[-1] = layernorm(last.reshape(B * N, D), params["norm_g"],
                            params["norm_b"]).reshape(B, N, D)
    return outputs


# ---------------------------- parameter creation --------------------------- #

def init_params(key, dim, depth, ff_mult):
    inner = dim * ff_mult
    f32 = jnp.float32

    def dense(k, shape, scale=0.02):
        return scale * jax.random.normal(k, shape, f32)

    keys = jax.random.split(key, depth)
    layers = []
    for d in range(depth):
        ks = jax.random.split(keys[d], 8)
        w_k = dense(ks[3], (dim, dim))
        w_v = dense(ks[4], (dim, dim))
        layers.append({
            "self_attn": {
                "ln_g": jnp.ones((1, dim), f32),
                "ln_b": jnp.zeros((1, dim), f32),
                "w_qkv": dense(ks[0], (dim, 3 * dim)),   # to_qkv (no bias)
                "w_out": dense(ks[1], (dim, dim)),       # to_out
                "b_out": jnp.zeros((1, dim), f32),
            },
            "cross_attn": {
                "ln_g": jnp.ones((1, dim), f32),
                "ln_b": jnp.zeros((1, dim), f32),
                "w_q": dense(ks[2], (dim, dim)),
                "w_kv": jnp.concatenate([w_k, w_v], axis=1),  # fused K/V proj
                "w_out": dense(ks[5], (dim, dim)),
                "b_out": jnp.zeros((1, dim), f32),
            },
            "ffn": {
                "ln_g": jnp.ones((1, dim), f32),
                "ln_b": jnp.zeros((1, dim), f32),
                "w1": dense(ks[6], (dim, inner)),
                "b1": jnp.zeros((1, inner), f32),
                "w2": dense(ks[7], (inner, dim)),
                "b2": jnp.zeros((1, dim), f32),
            },
        })
    return {"layers": layers,
            "norm_g": jnp.ones((1, dim), f32),
            "norm_b": jnp.zeros((1, dim), f32)}


# ----------------------------------- main ----------------------------------- #

if __name__ == "__main__":
    B, N, DIM, HEADS, DEPTH, FF_MULT = 2, 8, 32, 4, 2, 4

    key = jax.random.PRNGKey(0)
    kx, kc, kb, kp = jax.random.split(key, 4)
    x = jax.random.normal(kx, (B, N, DIM), jnp.float32)
    context = jax.random.normal(kc, (B, N, DIM), jnp.float32)
    rel_bias = 0.1 * jax.random.normal(kb, (HEADS, N, N), jnp.float32)
    params = init_params(kp, DIM, DEPTH, FF_MULT)

    out = base_transformer_cross_attn(x, context, rel_bias, params,
                                      num_heads=HEADS, output_layers=None)
    jax.block_until_ready(out)
    assert out.shape == (B, N, DIM) and out.dtype == jnp.float32
    print("KERNEL_OK")
</pallas_src>

<mosaic_0001>
module attributes {stable_mosaic.version = 11 : i64} {
  func.func @_matmul2d_kernel(%arg0: i32, %arg1: i32, %arg2: memref<16x32xf32, #tpu.memory_space<vmem>>, %arg3: memref<32x96xf32, #tpu.memory_space<vmem>>, %arg4: memref<1x32xf32, #tpu.memory_space<vmem>>, %arg5: memref<1x32xf32, #tpu.memory_space<vmem>>, %arg6: memref<16x96xf32, #tpu.memory_space<vmem>>, %arg7: memref<16x32xbf16, #tpu.memory_space<vmem>>) attributes {dimension_semantics = [#tpu.dimension_semantics<parallel>, #tpu.dimension_semantics<arbitrary>], iteration_bounds = array<i64: 1, 1>, scalar_prefetch = 0 : i64, scratch_operands = 1 : i64, tpu.core_type = #tpu.core_type<tc>, window_params = [{transform_indices = @transform_0, window_bounds = array<i64: 16, 32>}, {transform_indices = @transform_1, window_bounds = array<i64: 32, 96>}, {pipeline_mode = #tpu.pipeline_mode<synchronous>, transform_indices = @transform_2, window_bounds = array<i64: 1, 32>}, {pipeline_mode = #tpu.pipeline_mode<synchronous>, transform_indices = @transform_3, window_bounds = array<i64: 1, 32>}, {transform_indices = @transform_4, window_bounds = array<i64: 16, 96>}]} {
    %c0_i32 = arith.constant 0 : i32
    %0 = arith.cmpi eq, %arg1, %c0_i32 : i32
    %1 = arith.extui %0 : i1 to i32
    %c0_i32_0 = arith.constant 0 : i32
    %2 = arith.cmpi ne, %1, %c0_i32_0 : i32
    scf.if %2 {
      %c0_6 = arith.constant 0 : index
      %c0_7 = arith.constant 0 : index
      %8 = vector.load %arg2[%c0_6, %c0_7] : memref<16x32xf32, #tpu.memory_space<vmem>>, vector<16x32xf32>
      %cst_8 = arith.constant dense<0.000000e+00> : vector<16xf32>
      %9 = vector.multi_reduction <add>, %8, %cst_8 [1] : vector<16x32xf32> to vector<16xf32>
      %10 = vector.shape_cast %9 : vector<16xf32> to vector<16x1xf32>
      %cst_9 = arith.constant 3.200000e+01 : f32
      %11 = vector.broadcast %cst_9 : f32 to vector<16x1xf32>
      %12 = arith.divf %10, %11 : vector<16x1xf32>
      %13 = vector.broadcast %12 : vector<16x1xf32> to vector<16x32xf32>
      %14 = arith.subf %8, %13 : vector<16x32xf32>
      %15 = arith.mulf %14, %14 : vector<16x32xf32>
      %cst_10 = arith.constant dense<0.000000e+00> : vector<16xf32>
      %16 = vector.multi_reduction <add>, %15, %cst_10 [1] : vector<16x32xf32> to vector<16xf32>
      %17 = vector.shape_cast %16 : vector<16xf32> to vector<16x1xf32>
      %cst_11 = arith.constant 3.200000e+01 : f32
      %18 = vector.broadcast %cst_11 : f32 to vector<16x1xf32>
      %19 = arith.divf %17, %18 : vector<16x1xf32>
      %20 = vector.broadcast %12 : vector<16x1xf32> to vector<16x32xf32>
      %21 = arith.subf %8, %20 : vector<16x32xf32>
      %cst_12 = arith.constant 9.99999974E-6 : f32
      %22 = vector.broadcast %cst_12 : f32 to vector<16x1xf32>
      %23 = arith.addf %19, %22 : vector<16x1xf32>
      %24 = math.rsqrt %23 : vector<16x1xf32>
      %25 = vector.broadcast %24 : vector<16x1xf32> to vector<16x32xf32>
      %26 = arith.mulf %21, %25 : vector<16x32xf32>
      %c0_13 = arith.constant 0 : index
      %c0_14 = arith.constant 0 : index
      %27 = vector.load %arg4[%c0_13, %c0_14] : memref<1x32xf32, #tpu.memory_space<vmem>>, vector<1x32xf32>
      %28 = vector.broadcast %27 : vector<1x32xf32> to vector<16x32xf32>
      %29 = arith.mulf %26, %28 : vector<16x32xf32>
      %c0_15 = arith.constant 0 : index
      %c0_16 = arith.constant 0 : index
      %30 = vector.load %arg5[%c0_15, %c0_16] : memref<1x32xf32, #tpu.memory_space<vmem>>, vector<1x32xf32>
      %31 = vector.broadcast %30 : vector<1x32xf32> to vector<16x32xf32>
      %32 = arith.addf %29, %31 : vector<16x32xf32>
      %33 = arith.truncf %32 : vector<16x32xf32> to vector<16x32xbf16>
      %c0_17 = arith.constant 0 : index
      %c0_18 = arith.constant 0 : index
      %34 = vector.load %arg7[%c0_17, %c0_18] : memref<16x32xbf16, #tpu.memory_space<vmem>>, vector<16x32xbf16>
      tpu.vector_store %arg7[%c0_17, %c0_18], %33 {strides = array<i32>} : memref<16x32xbf16, #tpu.memory_space<vmem>>, vector<16x32xbf16>,
    } else {
    }
    %c0 = arith.constant 0 : index
    %c0_1 = arith.constant 0 : index
    %3 = vector.load %arg7[%c0, %c0_1] : memref<16x32xbf16, #tpu.memory_space<vmem>>, vector<16x32xbf16>
    %c0_2 = arith.constant 0 : index
    %c0_3 = arith.constant 0 : index
    %4 = vector.load %arg3[%c0_2, %c0_3] : memref<32x96xf32, #tpu.memory_space<vmem>>, vector<32x96xf32>
    %5 = arith.truncf %4 : vector<32x96xf32> to vector<32x96xbf16>
    %cst = arith.constant dense<0.000000e+00> : vector<16x96xf32>
    %6 = tpu.matmul %3, %5, %cst {dimension_numbers = #tpu.dot_dimension_numbers<[1], [0], [0], [1], [0, 0, 1, 1], [], []>} : vector<16x32xbf16>, vector<32x96xbf16>, vector<16x96xf32> -> vector<16x96xf32>
    %c0_4 = arith.constant 0 : index
    %c0_5 = arith.constant 0 : index
    %7 = vector.load %arg6[%c0_4, %c0_5] : memref<16x96xf32, #tpu.memory_space<vmem>>, vector<16x96xf32>
    tpu.vector_store %arg6[%c0_4, %c0_5], %6 {strides = array<i32>} : memref<16x96xf32, #tpu.memory_space<vmem>>, vector<16x96xf32>,
    return
  }
  func.func @transform_0(%arg0: i32, %arg1: i32) -> (i32, i32) {
    %c0_i32 = arith.constant 0 : i32
    %c0_i32_0 = arith.constant 0 : i32
    return %arg0, %c0_i32 : i32, i32
  }
  func.func @transform_1(%arg0: i32, %arg1: i32) -> (i32, i32) {
    %c0_i32 = arith.constant 0 : i32
    %c0_i32_0 = arith.constant 0 : i32
    return %c0_i32, %arg1 : i32, i32
  }
  func.func @transform_2(%arg0: i32, %arg1: i32) -> (i32, i32) {
    %c0_i32 = arith.constant 0 : i32
    %c0_i32_0 = arith.constant 0 : i32
    %c0_i32_1 = arith.constant 0 : i32
    return %c0_i32, %c0_i32_0 : i32, i32
  }
  func.func @transform_3(%arg0: i32, %arg1: i32) -> (i32, i32) {
    %c0_i32 = arith.constant 0 : i32
    %c0_i32_0 = arith.constant 0 : i32
    %c0_i32_1 = arith.constant 0 : i32
    return %c0_i32, %c0_i32_0 : i32, i32
  }
  func.func @transform_4(%arg0: i32, %arg1: i32) -> (i32, i32) {
    %c0_i32 = arith.constant 0 : i32
    return %arg0, %arg1 : i32, i32
  }
}

</mosaic_0001>

<bundles_post_ra>
// kernel: tpu_custom_call.1
= control target key start
LH: loop header
LB: loop body
LE: loop exit
PB: predicated region body
PF: predicated region fallthrough
CT: control target
= control target key end

     0   :  { %9 = vsyncpa [#allocation4], 0  ;;  %s347_s0 = inlined_call_operand.hbm [shape: f32[16,32], index: 0, kind: input, shape index: {}]   ;;  %s348_s1 = inlined_call_operand.hbm [shape: f32[32,96], index: 1, kind: input, shape index: {}]   ;;  %s349_s2 = inlined_call_operand.vmem [shape: f32[1,32], index: 2, kind: input, shape index: {}]   ;;  %s350_s3 = inlined_call_operand.vmem [shape: f32[1,32], index: 3, kind: input, shape index: {}]   ;;  %s351_s4 = inlined_call_operand.hbm [shape: f32[16,96], index: 4, kind: output, shape index: {}]  }
   0x1   :  { %10 = vsyncpa [#allocation7], 0 }
   0x2   :  { %11 = vsyncpa [#allocation5], 0  ;;  %s286_s15 = smov [#allocation3]  }
   0x3   :  { %s17_s16 = sshll.u32 %s286_s15, 4  ;;  %s18_s16 = int_to_ptr.vmem [resolvable:$true] %s17_s16 }
   0x4   :  { %s228_s17 = scalar_lea.vmem %s18_s16, 256  ;;  %p233_p1 = scmp.lt.s32.totalorder %s18_s16, %s18_s16 }
   0x5   :  { %p229_p0 = scmp.ne.s32.totalorder %s18_s16, %s228_s17  ;;  %p234_p2 = scmp.lt.s32.totalorder %s228_s17, %s228_s17 }
   0x7   :  { %p235_p3 = por %p234_p2, %p233_p1 }
   0x9   :  { %p236_p4 = pnand %p235_p3, %p229_p0 }
   0xb   :  { %239 = shalt.err (!%p236_p4)
}
   0xc   :  { %s287_s18 = smov 128   ;;  %s288_s19 = smov 8  }
   0xd   :  { %23 = dma.hbm_to_vmem [thread:$0]  %s347_s0, 256, %s18_s16, [#allocation4], %s287_s18, %s287_s18, %s288_s19  }
   0xe   :  { %s289_s22 = smov [#allocation6]  }
   0xf   :  { %s29_s23 = sshll.u32 %s289_s22, 4  ;;  %s30_s23 = int_to_ptr.vmem [resolvable:$true] %s29_s23 }
  0x10   :  { %s248_s24 = scalar_lea.vmem %s30_s23, 512  ;;  %p253_p6 = scmp.lt.s32.totalorder %s30_s23, %s30_s23 }
  0x11   :  { %p249_p5 = scmp.ne.s32.totalorder %s30_s23, %s248_s24  ;;  %p254_p7 = scmp.lt.s32.totalorder %s248_s24, %s248_s24 }
  0x13   :  { %p255_p8 = por %p254_p7, %p253_p6 }
  0x15   :  { %p256_p9 = pnand %p255_p8, %p249_p5 }
  0x17   :  { %259 = shalt.err (!%p256_p9)
}
  0x18   :  { %35 = dma.hbm_to_vmem [thread:$0]  %s348_s1, 512, %s30_s23, [#allocation7], %s287_s18, %s287_s18, %s288_s19  }
  0x19   :  { %280 = dma.done.wait [#allocation4], 256  }
  0x1a   :  { %281 = vsyncadd [#allocation4], 4294967040 }
  0x1b   :  { %282 = dma.done.wait [#allocation7], 512  }
  0x1c   :  { %283 = vsyncadd [#allocation7], 4294966784  ;;  %vm53_vm0 = vcmask 261120   ;;  %v51_v0 = vld [vmem:[#allocation3] sm:$0xff]  ;;  %v52_v1 = vld [vmem:[#allocation3 + $0x8] sm:$0xff]  ;;  %v290_v19 = vmov 0.0  }
  0x1d   :  { %v54_v2 = vsel %vm53_vm0, %v51_v0, 0.0  ;;  %v57_v3 = vsel %vm53_vm0, %v52_v1, 0.0  ;;  %v114_v14 = vld [vmem:[#allocation6 + $0x10] sm:$0xff]  ;;  %v115_v15 = vld [vmem:[#allocation6 + $0x18] sm:$0xff]  ;;  %v112_v17 = vld [vmem:[#allocation6] sm:$0xff]  ;;  %200 = vmatprep.subr.bf16.mxu0 %v290_v19  ;;  %vm291_vm1 = vmmov 0  }
  0x1e   :  { %55 = vadd.xlane.f32.xlu0 %v54_v2  ;;  %v117_v16 = vpack.c.bf16 %v115_v15, %v114_v14  ;;  %v113_v18 = vld [vmem:[#allocation6 + $0x8] sm:$0xff]  ;;  %204 = vmatprep.mubr.msk.bf16.mxu0 %vm291_vm1, %v290_v19  ;;  %vm107_vm2 = vcmask 257024   ;;  %vm168_vm3 = vcmask 785408  }
  0x1f   :  { %v116_v20 = vpack.c.bf16 %v113_v18, %v112_v17  ;;  %v189_v28 = vld [vmem:[%s349_s2] ss:$0 sm:$0xff]  ;;  %s292_s2 = smov [#allocation8]  }
  0x20   :  { %201 = vmatpush3.bf16.msra.mxu0 %v117_v16  ;;  %v190_v30 = vld [vmem:[%s350_s3] ss:$0 sm:$0xff]  ;;  %s176_s29 = sshll.u32 %s292_s2, 4  ;;  %s177_s29 = int_to_ptr.vmem [resolvable:$true] %s176_s29 }
  0x21   :  { %202 = vmatprep.subr.bf16.mxu0 %v290_v19  ;;  %s260_s3 = scalar_lea.vmem %s177_s29, 256  ;;  %p265_p11 = scmp.lt.s32.totalorder %s177_s29, %s177_s29 }
  0x22   :  { %58 = vadd.xlane.f32.xlu0 %v57_v3  ;;  %p261_p10 = scmp.ne.s32.totalorder %s177_s29, %s260_s3  ;;  %p266_p12 = scmp.lt.s32.totalorder %s260_s3, %s260_s3 }
  0x24   :  { %203 = vmatpush3.bf16.msra.mxu0 %v116_v20  ;;  %p267_p13 = por %p266_p12, %p265_p11 }
  0x26   :  { %p268_p0 = pnand %p267_p13, %p261_p10 }
  0xa7   :  { %v56_v4 = vpop.xlane.xlu0 %55 }
  0xa8   :  { %v61_v5 = vmul.f32 0.03125, %v56_v4 }
  0xaa   :  { %v63_v6 = vsub.f32 %v51_v0, %v61_v5 }
  0xab   :  { %v59_v7 = vpop.xlane.xlu0 %58 }
  0xac   :  { %v62_v8 = vmul.f32 0.03125, %v59_v7  ;;  %v65_v9 = vmul.f32 %v63_v6, %v63_v6 }
  0xae   :  { %v64_v10 = vsub.f32 %v52_v1, %v62_v8  ;;  %v67_v11 = vsel %vm53_vm0, %v65_v9, 0.0 }
  0xaf   :  { %68 = vadd.xlane.f32.xlu1 %v67_v11 }
  0xb0   :  { %v66_v12 = vmul.f32 %v64_v10, %v64_v10 }
  0xb2   :  { %v70_v13 = vsel %vm53_vm0, %v66_v12, 0.0 }
  0xb3   :  { %71 = vadd.xlane.f32.xlu1 %v70_v13 }
 0x138   :  { %v69_v21 = vpop.xlane.xlu1 %68 }
 0x139   :  { %v73_v22 = vmul.f32 0.03125, %v69_v21 }
 0x13b   :  { %v75_v23 = vadd.f32 1e-05, %v73_v22 }
 0x13c   :  { %v72_v24 = vpop.xlane.xlu1 %71 }
 0x13d   :  { %216 = vrsqrt.f32 %v75_v23  ;;  %v74_v25 = vmul.f32 0.03125, %v72_v24 }
 0x13f   :  { %v76_v26 = vadd.f32 1e-05, %v74_v25 }
 0x141   :  { %218 = vrsqrt.f32 %v76_v26 }
 0x14a   :  { %v217_v27 = vpop.eup %216 }
 0x14b   :  { %v79_v29 = vmul.f32 %v217_v27, %v63_v6 }
 0x14d   :  { %v88_v31 = vmul.f32 %v189_v28, %v79_v29 }
 0x14e   :  { %v219_v32 = vpop.eup %218 }
 0x14f   :  { %v97_v33 = vadd.f32 %v190_v30, %v88_v31  ;;  %v80_v34 = vmul.f32 %v219_v32, %v64_v10 }
 0x151   :  { %v195_v35 = vpack.c.bf16 %v97_v33, %v97_v33  ;;  %v89_v36 = vmul.f32 %v189_v28, %v80_v34 }
 0x153   :  { %108 = vst.msk [vmem:[#allocation2] sm:$0xf] %vm107_vm2, %v195_v35  ;;  %v98_v37 = vadd.f32 %v190_v30, %v89_v36 }
 0x155   :  { %v196_v38 = vpack.c.bf16 %v98_v37, %v98_v37 }
 0x157   :  { %109 = vst.msk [vmem:[#allocation2 + $0x4] sm:$0xf] %vm107_vm2, %v196_v38 }
 0x15e   :  { %v215_v39 = vld [vmem:[#allocation2] sm:$0xff]  }
 0x15f   :  { %205 = vmatmul.mubr.msk.bf16.vlgmr.msra.gmra.mxu0 %vm53_vm0, %v215_v39 }
 0x21f   :  { %v161_v40 = vpop.f32.mrf.mxu0 }
 0x220   :  { %169 = vst.msk [vmem:[#allocation8] sm:$0xff] %vm168_vm3, %v161_v40 }
 0x221   :  { %v206_v41 = vpop.f32.mrf.mxu0 }
 0x223   :  { %v164_v42 = vpop.f32.mrf.mxu0 }
 0x224   :  { %170 = vst.msk [vmem:[#allocation8 + $0x8] sm:$0xff] %vm168_vm3, %v164_v42 }
 0x225   :  { %v207_v43 = vpop.f32.mrf.mxu0 }
 0x226   :  { %271 = shalt.err (!%p268_p0)
}
 0x227   :  { %182 = dma.vmem_to_hbm [thread:$0]  %s177_s29, 256, %s351_s4, [#allocation5], %s287_s18, %s287_s18, %s288_s19  }
 0x228   :  { %284 = dma.done.wait [#allocation5], 256  }
 0x229   :  { %285 = vsyncadd [#allocation5], 4294967040 }
 0x22a   :  { %186 = vsyncpa [#allocation4], 1 }
 0x22b   :  { %187 = vsyncpa [#allocation7], 1 }
 0x22c   :  { %188 = vsyncpa [#allocation5], 1 }

</bundles_post_ra>
